<compile_context>
chip_gen: v5e
topology: v5e:2x2
jax: 0.10.0
libtpu: 0.0.40
codegen_flags: <defaults>
</compile_context>

<pallas_src>
import functools

import jax
import jax.numpy as jnp
from jax.experimental import pallas as pl
from jax.experimental.pallas import tpu as pltpu


def _round_up(x, m):
    return ((x + m - 1) // m) * m


def _vmem_capacity_bytes():
    """Physical VMEM per TensorCore; conservative (v7x-sized) default if unknown."""
    try:
        info = pltpu.get_tpu_info()
        cap = int(getattr(info, "vmem_capacity_bytes", 0) or 0)
        if cap > 0:
            return cap
    except Exception:
        pass
    return 64 << 20


def _vmem_budgets():
    """(tile_budget_bytes, scoped_limit_cap_bytes), generation aware.

    64 MiB parts (v7x): keep the double-buffered live set under ~28 MiB and cap
    the scoped limit at 48 MiB (leave headroom for compiler internal scratch).
    128 MiB parts (v5e/v6e): bigger tiles keep the cheaper single-pass (6-pass)
    structure viable for larger C*HW.
    """
    cap = _vmem_capacity_bytes()
    if cap <= (80 << 20):
        return 28 << 20, 48 << 20
    return 80 << 20, 100 << 20


def _choose_tb(B, per_row_bytes, budget_bytes, target_steps=4):
    """Largest TB dividing B whose double-buffered live set fits the budget while
    keeping >= target_steps grid steps when possible (pipeline overlap + v7x
    megacore load balance)."""
    cap = max(1, budget_bytes // per_row_bytes)
    cap = min(cap, max(1, B // target_steps))
    cap = int(max(1, min(cap, B)))
    tb = 1
    for cand in range(1, cap + 1):
        if B % cand == 0:
            tb = cand
    return tb


def _softmax_rows(v):
    """Row-wise softmax (exact normalization), f32 in / f32 out."""
    m = jnp.max(v, axis=-1, keepdims=True)
    e = jnp.exp(v - m)
    return e / jnp.sum(e, axis=-1, keepdims=True)


def hfm_forward(x1, x2, x3, w_fc, prelu_alpha, w_fcs, *,
                donate_inputs=False, vmem_budget_bytes=None):
    """HFM forward.

    x1/x2/x3: [B, C, H, W] (float32 or bfloat16).
    w_fc: [C, d] fc weight (1x1 conv, no bias).  prelu_alpha: scalar PReLU slope.
    w_fcs: [3, d, C] per-branch 1x1 conv weights (no bias).
    donate_inputs: alias x_i buffers to the outputs (inference-only, in place).
    Returns (f1, f2, f3), each [B, C, H, W] in the input dtype.
    """
    B, C, H, W = x1.shape
    d = w_fc.shape[1]
    HW = H * W
    inv_hw = 1.0 / float(HW)
    out_dtype = x1.dtype
    f32 = jnp.float32

    # Weights / PReLU slope stay f32 (tiny, reused every grid step).
    w_fc = jnp.asarray(w_fc, f32)
    w_fcs = jnp.asarray(w_fcs, f32)
    alpha = jnp.asarray([prelu_alpha], dtype=f32)

    # Flatten spatial dims: free bitcasts, no padding, no post-kernel crop.
    x1f = x1.reshape(B, C, HW)
    x2f = x2.reshape(B, C, HW)
    x3f = x3.reshape(B, C, HW)

    tile_budget, limit_cap = _vmem_budgets()
    if vmem_budget_bytes is not None:
        tile_budget = int(vmem_budget_bytes)

    # Conservative 4 B/elem sizing: covers f32 compute temporaries of bf16 tiles.
    per_row_bytes = 12 * C * HW * 4
    weight_bytes = 4 * (C * d + 3 * d * C) + 256

    single_pass = (per_row_bytes <= tile_budget) and (B >= 2)

    if single_pass:
        # ---- Single fused streaming pass, grid over batch -------------------
        TB = _choose_tb(B, per_row_bytes, tile_budget)
        grid = (B // TB,)
        x_spec = pl.BlockSpec((TB, C, HW), lambda b: (b, 0, 0))
        w_in_spec = pl.BlockSpec((C, d), lambda b: (0, 0))
        w_out_spec = pl.BlockSpec((d, C), lambda b: (0, 0))
        out_shape = jax.ShapeDtypeStruct((B, C, HW), out_dtype)

        need = 12 * TB * C * HW * 4 + weight_bytes + (2 << 20)
        vmem_limit = int(min(limit_cap, max(8 << 20, need)))

        def kernel(alpha_ref, x1_ref, x2_ref, x3_ref,
                   wfc_ref, w1_ref, w2_ref, w3_ref,
                   f1_ref, f2_ref, f3_ref):
            # GAP over the flattened spatial (lane) axis, accumulated in f32.
            fea_s = (jnp.sum(x1_ref[...].astype(f32), axis=-1) +
                     jnp.sum(x2_ref[...].astype(f32), axis=-1) +
                     jnp.sum(x3_ref[...].astype(f32), axis=-1)) * inv_hw   # (TB, C)

            # fc: C->d (1x1 conv, no bias) + PReLU (single shared slope).
            fea_z = jnp.dot(fea_s, wfc_ref[...], preferred_element_type=f32)
            a = alpha_ref[0]
            fea_z = jnp.where(fea_z >= 0.0, fea_z, a * fea_z)              # (TB, d)

            # Per-branch d->C projection + channel softmax.  Three small separate
            # matmuls keep every softmax operand lane-aligned (no C..2C slices).
            a1 = _softmax_rows(jnp.dot(fea_z, w1_ref[...], preferred_element_type=f32))
            a2 = _softmax_rows(jnp.dot(fea_z, w2_ref[...], preferred_element_type=f32))
            a3 = _softmax_rows(jnp.dot(fea_z, w3_ref[...], preferred_element_type=f32))

            # Modulate: broadcast attention over the spatial axis, cast, store.
            f1_ref[...] = (x1_ref[...].astype(f32) * a1[:, :, None]).astype(f1_ref.dtype)
            f2_ref[...] = (x2_ref[...].astype(f32) * a2[:, :, None]).astype(f2_ref.dtype)
            f3_ref[...] = (x3_ref[...].astype(f32) * a3[:, :, None]).astype(f3_ref.dtype)

        alias = {1: 0, 2: 1, 3: 2} if donate_inputs else {}
        f1, f2, f3 = pl.pallas_call(
            kernel,
            out_shape=(out_shape, out_shape, out_shape),
            grid=grid,
            in_specs=[
                pl.BlockSpec(memory_space=pltpu.SMEM),      # PReLU slope
                x_spec, x_spec, x_spec,                     # x1, x2, x3
                w_in_spec,                                  # w_fc   (C, d)
                w_out_spec, w_out_spec, w_out_spec,         # branch weights (d, C)
            ],
            out_specs=(x_spec, x_spec, x_spec),
            input_output_aliases=alias,
            compiler_params=pltpu.CompilerParams(
                dimension_semantics=("parallel",),
                vmem_limit_bytes=vmem_limit),
        )(alpha, x1f, x2f, x3f, w_fc, w_fcs[0], w_fcs[1], w_fcs[2])

    else:
        # ---- Two-phase fallback (B == 1 or a single row exceeds VMEM) -------
        # Phase 1 (plain XLA, one extra read pass of x1..x3): per-(branch,batch)
        # channel attention, accumulated in f32.
        fea_s = (jnp.sum(x1f, axis=-1, dtype=f32) +
                 jnp.sum(x2f, axis=-1, dtype=f32) +
                 jnp.sum(x3f, axis=-1, dtype=f32)) * inv_hw                 # (B, C)
        fea_z = fea_s @ w_fc
        fea_z = jnp.where(fea_z >= 0.0, fea_z, jnp.float32(prelu_alpha) * fea_z)
        a1 = _softmax_rows(fea_z @ w_fcs[0])
        a2 = _softmax_rows(fea_z @ w_fcs[1])
        a3 = _softmax_rows(fea_z @ w_fcs[2])

        # Phase 2: pure streaming modulate, tiled over (batch, spatial).
        per_col_bytes = 12 * C * 4              # live bytes per spatial column
        max_thw = max(128, (tile_budget // per_col_bytes) // 128 * 128)
        want_steps = max(2, 4 // max(1, B))     # total grid steps >= ~4
        thw = min(max_thw, max(128, _round_up(pl.cdiv(HW, want_steps), 128)))
        if thw >= HW or HW < 256:
            thw, ns = HW, 1                     # full-width block (legal for any HW)
        else:
            ns = pl.cdiv(HW, thw)               # a partial final block is clipped by
                                                # Pallas (padded read, masked store)
        grid = (B, ns)

        x_spec = pl.BlockSpec((1, C, thw), lambda b, s: (b, 0, s))
        a_spec = pl.BlockSpec((1, C), lambda b, s: (b, 0))
        out_shape = jax.ShapeDtypeStruct((B, C, HW), out_dtype)

        # TODO(synk): for extreme channel counts (12*C*128*4 > budget) add a
        # channel-axis split as well; not needed for realistic HFM sizes.
        need = 12 * C * thw * 4 + 12 * C * 4 + (2 << 20)
        vmem_limit = int(min(limit_cap, max(8 << 20, need)))

        def mod_kernel(a1_ref, a2_ref, a3_ref, x1_ref, x2_ref, x3_ref,
                       f1_ref, f2_ref, f3_ref):
            f1_ref[...] = (x1_ref[...].astype(f32) * a1_ref[...][:, :, None]).astype(f1_ref.dtype)
            f2_ref[...] = (x2_ref[...].astype(f32) * a2_ref[...][:, :, None]).astype(f2_ref.dtype)
            f3_ref[...] = (x3_ref[...].astype(f32) * a3_ref[...][:, :, None]).astype(f3_ref.dtype)

        alias = {3: 0, 4: 1, 5: 2} if donate_inputs else {}
        f1, f2, f3 = pl.pallas_call(
            mod_kernel,
            out_shape=(out_shape, out_shape, out_shape),
            grid=grid,
            in_specs=[a_spec, a_spec, a_spec, x_spec, x_spec, x_spec],
            out_specs=(x_spec, x_spec, x_spec),
            input_output_aliases=alias,
            compiler_params=pltpu.CompilerParams(
                dimension_semantics=("parallel", "parallel"),
                vmem_limit_bytes=vmem_limit),
        )(a1, a2, a3, x1f, x2f, x3f)

    return (f1.reshape(B, C, H, W),
            f2.reshape(B, C, H, W),
            f3.reshape(B, C, H, W))


def _reference(x1, x2, x3, w_fc, prelu_alpha, w_fcs):
    """Pure-JAX reference mirroring the torch forward (computed in f32)."""
    f32 = jnp.float32
    x1, x2, x3 = x1.astype(f32), x2.astype(f32), x3.astype(f32)
    fea_u = x1 + x2 + x3
    fea_s = jnp.mean(fea_u, axis=(2, 3))                        # [B, C]
    fea_z = fea_s @ w_fc.astype(f32)                            # [B, d]
    fea_z = jnp.where(fea_z >= 0, fea_z, prelu_alpha * fea_z)
    outs = []
    for i, x in enumerate((x1, x2, x3)):
        v = fea_z @ w_fcs[i].astype(f32)                        # [B, C]
        att = jax.nn.softmax(v, axis=-1)                        # softmax over channels
        outs.append(x * att[:, :, None, None])
    return tuple(outs)


if __name__ == "__main__":
    def make_inputs(key, B, C, H, W, dtype):
        d = max(C // 2, 32)
        k1, k2, k3, kw1, kw2 = jax.random.split(key, 5)
        x1 = jax.random.normal(k1, (B, C, H, W), dtype=jnp.float32).astype(dtype)
        x2 = jax.random.normal(k2, (B, C, H, W), dtype=jnp.float32).astype(dtype)
        x3 = jax.random.normal(k3, (B, C, H, W), dtype=jnp.float32).astype(dtype)
        w_fc = 0.1 * jax.random.normal(kw1, (C, d), dtype=jnp.float32)
        w_fcs = 0.1 * jax.random.normal(kw2, (3, d, C), dtype=jnp.float32)
        return x1, x2, x3, w_fc, 0.25, w_fcs

    def check(outs, refs, tol):
        for got, ref in zip(outs, refs):
            assert got.shape == ref.shape, "shape mismatch vs reference"
            assert jnp.allclose(got.astype(jnp.float32), ref, atol=tol, rtol=tol), \
                "mismatch vs reference"

    key = jax.random.PRNGKey(0)
    keys = jax.random.split(key, 5)

    # 1) f32, HW a multiple of 128 -> fully lane-dense single-pass path.
    args = make_inputs(keys[0], B=2, C=8, H=16, W=16, dtype=jnp.float32)
    outs = hfm_forward(*args)
    jax.block_until_ready(outs)
    check(outs, _reference(*args), tol=2e-3)

    # 2) f32, HW = 130 (not a multiple of 128): no pad/crop, masked tail store.
    args = make_inputs(keys[1], B=4, C=8, H=10, W=13, dtype=jnp.float32)
    outs = hfm_forward(*args)
    jax.block_until_ready(outs)
    check(outs, _reference(*args), tol=2e-3)

    # 3) bf16 I/O (halves HBM traffic); compute stays f32 inside the kernel.
    args = make_inputs(keys[2], B=2, C=8, H=12, W=12, dtype=jnp.bfloat16)
    outs = hfm_forward(*args)
    jax.block_until_ready(outs)
    check(outs, _reference(*args), tol=2e-2)

    # 4) B=1 with an artificially small VMEM budget -> two-phase fallback with a
    #    (batch, spatial) grid (exercises the v7x large-H*W / small-B path).
    args = make_inputs(keys[3], B=1, C=16, H=16, W=16, dtype=jnp.float32)
    outs = hfm_forward(*args, vmem_budget_bytes=128 << 10)
    jax.block_until_ready(outs)
    check(outs, _reference(*args), tol=2e-3)

    # 5) In-place (donated) inference variant under jit.
    x1, x2, x3, w_fc, prelu_alpha, w_fcs = make_inputs(
        keys[4], B=2, C=8, H=8, W=8, dtype=jnp.float32)
    refs = _reference(x1, x2, x3, w_fc, prelu_alpha, w_fcs)
    fwd = jax.jit(
        functools.partial(hfm_forward, w_fc=w_fc, prelu_alpha=prelu_alpha,
                          w_fcs=w_fcs, donate_inputs=True),
        donate_argnums=(0, 1, 2))
    outs = fwd(x1, x2, x3)
    jax.block_until_ready(outs)
    check(outs, refs, tol=2e-3)

    print("KERNEL_OK")
</pallas_src>

<mosaic_0001>
module attributes {stable_mosaic.version = 11 : i64} {
  func.func @kernel(%arg0: i32, %arg1: memref<1xf32, #tpu.memory_space<smem>>, %arg2: memref<1x8x256xf32, #tpu.memory_space<vmem>>, %arg3: memref<1x8x256xf32, #tpu.memory_space<vmem>>, %arg4: memref<1x8x256xf32, #tpu.memory_space<vmem>>, %arg5: memref<8x32xf32, #tpu.memory_space<vmem>>, %arg6: memref<32x8xf32, #tpu.memory_space<vmem>>, %arg7: memref<32x8xf32, #tpu.memory_space<vmem>>, %arg8: memref<32x8xf32, #tpu.memory_space<vmem>>, %arg9: memref<1x8x256xf32, #tpu.memory_space<vmem>>, %arg10: memref<1x8x256xf32, #tpu.memory_space<vmem>>, %arg11: memref<1x8x256xf32, #tpu.memory_space<vmem>>) attributes {dimension_semantics = [#tpu.dimension_semantics<parallel>], iteration_bounds = array<i64: 2>, scalar_prefetch = 0 : i64, scratch_operands = 0 : i64, tpu.core_type = #tpu.core_type<tc>, window_params = [{transform_indices = @transform_0, window_bounds = array<i64: 1>}, {transform_indices = @transform_1, window_bounds = array<i64: 1, 8, 256>}, {transform_indices = @transform_2, window_bounds = array<i64: 1, 8, 256>}, {transform_indices = @transform_3, window_bounds = array<i64: 1, 8, 256>}, {pipeline_mode = #tpu.pipeline_mode<synchronous>, transform_indices = @transform_4, window_bounds = array<i64: 8, 32>}, {pipeline_mode = #tpu.pipeline_mode<synchronous>, transform_indices = @transform_5, window_bounds = array<i64: 32, 8>}, {pipeline_mode = #tpu.pipeline_mode<synchronous>, transform_indices = @transform_6, window_bounds = array<i64: 32, 8>}, {pipeline_mode = #tpu.pipeline_mode<synchronous>, transform_indices = @transform_7, window_bounds = array<i64: 32, 8>}, {transform_indices = @transform_8, window_bounds = array<i64: 1, 8, 256>}, {transform_indices = @transform_9, window_bounds = array<i64: 1, 8, 256>}, {transform_indices = @transform_10, window_bounds = array<i64: 1, 8, 256>}]} {
    %c0 = arith.constant 0 : index
    %c0_0 = arith.constant 0 : index
    %c0_1 = arith.constant 0 : index
    %0 = vector.load %arg2[%c0, %c0_0, %c0_1] : memref<1x8x256xf32, #tpu.memory_space<vmem>>, vector<1x8x256xf32>
    %cst = arith.constant dense<0.000000e+00> : vector<1x8xf32>
    %1 = vector.multi_reduction <add>, %0, %cst [2] : vector<1x8x256xf32> to vector<1x8xf32>
    %c0_2 = arith.constant 0 : index
    %c0_3 = arith.constant 0 : index
    %c0_4 = arith.constant 0 : index
    %2 = vector.load %arg3[%c0_2, %c0_3, %c0_4] : memref<1x8x256xf32, #tpu.memory_space<vmem>>, vector<1x8x256xf32>
    %cst_5 = arith.constant dense<0.000000e+00> : vector<1x8xf32>
    %3 = vector.multi_reduction <add>, %2, %cst_5 [2] : vector<1x8x256xf32> to vector<1x8xf32>
    %4 = arith.addf %1, %3 : vector<1x8xf32>
    %c0_6 = arith.constant 0 : index
    %c0_7 = arith.constant 0 : index
    %c0_8 = arith.constant 0 : index
    %5 = vector.load %arg4[%c0_6, %c0_7, %c0_8] : memref<1x8x256xf32, #tpu.memory_space<vmem>>, vector<1x8x256xf32>
    %cst_9 = arith.constant dense<0.000000e+00> : vector<1x8xf32>
    %6 = vector.multi_reduction <add>, %5, %cst_9 [2] : vector<1x8x256xf32> to vector<1x8xf32>
    %7 = arith.addf %4, %6 : vector<1x8xf32>
    %cst_10 = arith.constant 3.906250e-03 : f32
    %8 = vector.broadcast %cst_10 : f32 to vector<1x8xf32>
    %9 = arith.mulf %7, %8 : vector<1x8xf32>
    %c0_11 = arith.constant 0 : index
    %c0_12 = arith.constant 0 : index
    %10 = vector.load %arg5[%c0_11, %c0_12] : memref<8x32xf32, #tpu.memory_space<vmem>>, vector<8x32xf32>
    %cst_13 = arith.constant dense<0.000000e+00> : vector<1x32xf32>
    %11 = tpu.matmul %9, %10, %cst_13 {dimension_numbers = #tpu.dot_dimension_numbers<[1], [0], [0], [1], [0, 0, 1, 1], [], []>} : vector<1x8xf32>, vector<8x32xf32>, vector<1x32xf32> -> vector<1x32xf32>
    %c0_14 = arith.constant 0 : index
    %12 = memref.load %arg1[%c0_14] : memref<1xf32, #tpu.memory_space<smem>>
    %cst_15 = arith.constant 0.000000e+00 : f32
    %13 = vector.broadcast %cst_15 : f32 to vector<1x32xf32>
    %14 = arith.cmpf oge, %11, %13 : vector<1x32xf32>
    %15 = vector.broadcast %12 : f32 to vector<1x32xf32>
    %16 = arith.mulf %15, %11 : vector<1x32xf32>
    %17 = arith.select %14, %11, %16 : vector<1x32xi1>, vector<1x32xf32>
    %c0_16 = arith.constant 0 : index
    %c0_17 = arith.constant 0 : index
    %18 = vector.load %arg6[%c0_16, %c0_17] : memref<32x8xf32, #tpu.memory_space<vmem>>, vector<32x8xf32>
    %cst_18 = arith.constant dense<0.000000e+00> : vector<1x8xf32>
    %19 = tpu.matmul %17, %18, %cst_18 {dimension_numbers = #tpu.dot_dimension_numbers<[1], [0], [0], [1], [0, 0, 1, 1], [], []>} : vector<1x32xf32>, vector<32x8xf32>, vector<1x8xf32> -> vector<1x8xf32>
    %cst_19 = arith.constant dense<0xFF800000> : vector<1xf32>
    %20 = vector.multi_reduction <maximumf>, %19, %cst_19 [1] : vector<1x8xf32> to vector<1xf32>
    %21 = vector.shape_cast %20 : vector<1xf32> to vector<1x1xf32>
    %22 = vector.broadcast %21 : vector<1x1xf32> to vector<1x8xf32>
    %23 = arith.subf %19, %22 : vector<1x8xf32>
    %24 = math.exp %23 : vector<1x8xf32>
    %cst_20 = arith.constant dense<0.000000e+00> : vector<1xf32>
    %25 = vector.multi_reduction <add>, %24, %cst_20 [1] : vector<1x8xf32> to vector<1xf32>
    %26 = vector.shape_cast %25 : vector<1xf32> to vector<1x1xf32>
    %27 = vector.broadcast %26 : vector<1x1xf32> to vector<1x8xf32>
    %28 = arith.divf %24, %27 : vector<1x8xf32>
    %c0_21 = arith.constant 0 : index
    %c0_22 = arith.constant 0 : index
    %29 = vector.load %arg7[%c0_21, %c0_22] : memref<32x8xf32, #tpu.memory_space<vmem>>, vector<32x8xf32>
    %cst_23 = arith.constant dense<0.000000e+00> : vector<1x8xf32>
    %30 = tpu.matmul %17, %29, %cst_23 {dimension_numbers = #tpu.dot_dimension_numbers<[1], [0], [0], [1], [0, 0, 1, 1], [], []>} : vector<1x32xf32>, vector<32x8xf32>, vector<1x8xf32> -> vector<1x8xf32>
    %cst_24 = arith.constant dense<0xFF800000> : vector<1xf32>
    %31 = vector.multi_reduction <maximumf>, %30, %cst_24 [1] : vector<1x8xf32> to vector<1xf32>
    %32 = vector.shape_cast %31 : vector<1xf32> to vector<1x1xf32>
    %33 = vector.broadcast %32 : vector<1x1xf32> to vector<1x8xf32>
    %34 = arith.subf %30, %33 : vector<1x8xf32>
    %35 = math.exp %34 : vector<1x8xf32>
    %cst_25 = arith.constant dense<0.000000e+00> : vector<1xf32>
    %36 = vector.multi_reduction <add>, %35, %cst_25 [1] : vector<1x8xf32> to vector<1xf32>
    %37 = vector.shape_cast %36 : vector<1xf32> to vector<1x1xf32>
    %38 = vector.broadcast %37 : vector<1x1xf32> to vector<1x8xf32>
    %39 = arith.divf %35, %38 : vector<1x8xf32>
    %c0_26 = arith.constant 0 : index
    %c0_27 = arith.constant 0 : index
    %40 = vector.load %arg8[%c0_26, %c0_27] : memref<32x8xf32, #tpu.memory_space<vmem>>, vector<32x8xf32>
    %cst_28 = arith.constant dense<0.000000e+00> : vector<1x8xf32>
    %41 = tpu.matmul %17, %40, %cst_28 {dimension_numbers = #tpu.dot_dimension_numbers<[1], [0], [0], [1], [0, 0, 1, 1], [], []>} : vector<1x32xf32>, vector<32x8xf32>, vector<1x8xf32> -> vector<1x8xf32>
    %cst_29 = arith.constant dense<0xFF800000> : vector<1xf32>
    %42 = vector.multi_reduction <maximumf>, %41, %cst_29 [1] : vector<1x8xf32> to vector<1xf32>
    %43 = vector.shape_cast %42 : vector<1xf32> to vector<1x1xf32>
    %44 = vector.broadcast %43 : vector<1x1xf32> to vector<1x8xf32>
    %45 = arith.subf %41, %44 : vector<1x8xf32>
    %46 = math.exp %45 : vector<1x8xf32>
    %cst_30 = arith.constant dense<0.000000e+00> : vector<1xf32>
    %47 = vector.multi_reduction <add>, %46, %cst_30 [1] : vector<1x8xf32> to vector<1xf32>
    %48 = vector.shape_cast %47 : vector<1xf32> to vector<1x1xf32>
    %49 = vector.broadcast %48 : vector<1x1xf32> to vector<1x8xf32>
    %50 = arith.divf %46, %49 : vector<1x8xf32>
    %c0_31 = arith.constant 0 : index
    %c0_32 = arith.constant 0 : index
    %c0_33 = arith.constant 0 : index
    %51 = vector.load %arg2[%c0_31, %c0_32, %c0_33] : memref<1x8x256xf32, #tpu.memory_space<vmem>>, vector<1x8x256xf32>
    %52 = vector.shape_cast %28 : vector<1x8xf32> to vector<1x8x1xf32>
    %53 = vector.broadcast %52 : vector<1x8x1xf32> to vector<1x8x256xf32>
    %54 = arith.mulf %51, %53 : vector<1x8x256xf32>
    %c0_34 = arith.constant 0 : index
    %c0_35 = arith.constant 0 : index
    %c0_36 = arith.constant 0 : index
    %55 = vector.load %arg9[%c0_34, %c0_35, %c0_36] : memref<1x8x256xf32, #tpu.memory_space<vmem>>, vector<1x8x256xf32>
    tpu.vector_store %arg9[%c0_34, %c0_35, %c0_36], %54 {strides = array<i32>} : memref<1x8x256xf32, #tpu.memory_space<vmem>>, vector<1x8x256xf32>,
    %c0_37 = arith.constant 0 : index
    %c0_38 = arith.constant 0 : index
    %c0_39 = arith.constant 0 : index
    %56 = vector.load %arg3[%c0_37, %c0_38, %c0_39] : memref<1x8x256xf32, #tpu.memory_space<vmem>>, vector<1x8x256xf32>
    %57 = vector.shape_cast %39 : vector<1x8xf32> to vector<1x8x1xf32>
    %58 = vector.broadcast %57 : vector<1x8x1xf32> to vector<1x8x256xf32>
    %59 = arith.mulf %56, %58 : vector<1x8x256xf32>
    %c0_40 = arith.constant 0 : index
    %c0_41 = arith.constant 0 : index
    %c0_42 = arith.constant 0 : index
    %60 = vector.load %arg10[%c0_40, %c0_41, %c0_42] : memref<1x8x256xf32, #tpu.memory_space<vmem>>, vector<1x8x256xf32>
    tpu.vector_store %arg10[%c0_40, %c0_41, %c0_42], %59 {strides = array<i32>} : memref<1x8x256xf32, #tpu.memory_space<vmem>>, vector<1x8x256xf32>,
    %c0_43 = arith.constant 0 : index
    %c0_44 = arith.constant 0 : index
    %c0_45 = arith.constant 0 : index
    %61 = vector.load %arg4[%c0_43, %c0_44, %c0_45] : memref<1x8x256xf32, #tpu.memory_space<vmem>>, vector<1x8x256xf32>
    %62 = vector.shape_cast %50 : vector<1x8xf32> to vector<1x8x1xf32>
    %63 = vector.broadcast %62 : vector<1x8x1xf32> to vector<1x8x256xf32>
    %64 = arith.mulf %61, %63 : vector<1x8x256xf32>
    %c0_46 = arith.constant 0 : index
    %c0_47 = arith.constant 0 : index
    %c0_48 = arith.constant 0 : index
    %65 = vector.load %arg11[%c0_46, %c0_47, %c0_48] : memref<1x8x256xf32, #tpu.memory_space<vmem>>, vector<1x8x256xf32>
    tpu.vector_store %arg11[%c0_46, %c0_47, %c0_48], %64 {strides = array<i32>} : memref<1x8x256xf32, #tpu.memory_space<vmem>>, vector<1x8x256xf32>,
    return
  }
  func.func @transform_0(%arg0: i32) -> i32 {
    %c0_i32 = arith.constant 0 : i32
    %c0_i32_0 = arith.constant 0 : i32
    return %c0_i32 : i32
  }
  func.func @transform_1(%arg0: i32) -> (i32, i32, i32) {
    %c0_i32 = arith.constant 0 : i32
    %c0_i32_0 = arith.constant 0 : i32
    %c0_i32_1 = arith.constant 0 : i32
    return %arg0, %c0_i32, %c0_i32_0 : i32, i32, i32
  }
  func.func @transform_2(%arg0: i32) -> (i32, i32, i32) {
    %c0_i32 = arith.constant 0 : i32
    %c0_i32_0 = arith.constant 0 : i32
    %c0_i32_1 = arith.constant 0 : i32
    return %arg0, %c0_i32, %c0_i32_0 : i32, i32, i32
  }
  func.func @transform_3(%arg0: i32) -> (i32, i32, i32) {
    %c0_i32 = arith.constant 0 : i32
    %c0_i32_0 = arith.constant 0 : i32
    %c0_i32_1 = arith.constant 0 : i32
    return %arg0, %c0_i32, %c0_i32_0 : i32, i32, i32
  }
  func.func @transform_4(%arg0: i32) -> (i32, i32) {
    %c0_i32 = arith.constant 0 : i32
    %c0_i32_0 = arith.constant 0 : i32
    %c0_i32_1 = arith.constant 0 : i32
    return %c0_i32, %c0_i32_0 : i32, i32
  }
  func.func @transform_5(%arg0: i32) -> (i32, i32) {
    %c0_i32 = arith.constant 0 : i32
    %c0_i32_0 = arith.constant 0 : i32
    %c0_i32_1 = arith.constant 0 : i32
    return %c0_i32, %c0_i32_0 : i32, i32
  }
  func.func @transform_6(%arg0: i32) -> (i32, i32) {
    %c0_i32 = arith.constant 0 : i32
    %c0_i32_0 = arith.constant 0 : i32
    %c0_i32_1 = arith.constant 0 : i32
    return %c0_i32, %c0_i32_0 : i32, i32
  }
  func.func @transform_7(%arg0: i32) -> (i32, i32) {
    %c0_i32 = arith.constant 0 : i32
    %c0_i32_0 = arith.constant 0 : i32
    %c0_i32_1 = arith.constant 0 : i32
    return %c0_i32, %c0_i32_0 : i32, i32
  }
  func.func @transform_8(%arg0: i32) -> (i32, i32, i32) {
    %c0_i32 = arith.constant 0 : i32
    %c0_i32_0 = arith.constant 0 : i32
    %c0_i32_1 = arith.constant 0 : i32
    return %arg0, %c0_i32, %c0_i32_0 : i32, i32, i32
  }
  func.func @transform_9(%arg0: i32) -> (i32, i32, i32) {
    %c0_i32 = arith.constant 0 : i32
    %c0_i32_0 = arith.constant 0 : i32
    %c0_i32_1 = arith.constant 0 : i32
    return %arg0, %c0_i32, %c0_i32_0 : i32, i32, i32
  }
  func.func @transform_10(%arg0: i32) -> (i32, i32, i32) {
    %c0_i32 = arith.constant 0 : i32
    %c0_i32_0 = arith.constant 0 : i32
    %c0_i32_1 = arith.constant 0 : i32
    return %arg0, %c0_i32, %c0_i32_0 : i32, i32, i32
  }
}

</mosaic_0001>

<bundles_post_ra>
// kernel: tpu_custom_call.1
= control target key start
LH: loop header
LB: loop body
LE: loop exit
PB: predicated region body
PF: predicated region fallthrough
CT: control target
= control target key end

     0   :  { %s1356_s0 = inlined_call_operand.<no memory space> [shape: f32[1], index: 0, kind: input, shape index: {}]   ;;  %s1357_s1 = inlined_call_operand.vmem [shape: f32[2,8,256], index: 1, kind: input, shape index: {}]   ;;  %s1358_s2 = inlined_call_operand.vmem [shape: f32[2,8,256], index: 2, kind: input, shape index: {}]   ;;  %s1359_s3 = inlined_call_operand.vmem [shape: f32[2,8,256], index: 3, kind: input, shape index: {}]   ;;  %s1360_s4 = inlined_call_operand.vmem [shape: f32[8,32], index: 4, kind: input, shape index: {}]   ;;  %s1361_s5 = inlined_call_operand.vmem [shape: f32[32,8], index: 5, kind: input, shape index: {}]   ;;  %s1362_s6 = inlined_call_operand.vmem [shape: f32[32,8], index: 6, kind: input, shape index: {}]   ;;  %s1363_s7 = inlined_call_operand.vmem [shape: f32[32,8], index: 7, kind: input, shape index: {}]   ;;  %s1364_s8 = inlined_call_operand.hbm [shape: f32[2,8,256], index: 8, kind: output, shape index: {0}]   ;;  %s1365_s9 = inlined_call_operand.hbm [shape: f32[2,8,256], index: 9, kind: output, shape index: {1}]   ;;  %s1366_s10 = inlined_call_operand.hbm [shape: f32[2,8,256], index: 10, kind: output, shape index: {2}]  }
   0x1   :  { %1369 = sst [smem:[#allocation12_spill]] %s1357_s1 }
   0x2   :  { %1370 = sst [smem:[#allocation13_spill]] %s1358_s2 }
   0x3   :  { %1371 = sst [smem:[#allocation14_spill]] %s1359_s3 }
   0x4   :  { %1372 = sst [smem:[#allocation15_spill]] %s1360_s4 }
   0x5   :  { %1373 = sst [smem:[#allocation16_spill]] %s1361_s5 }
   0x6   :  { %1374 = sst [smem:[#allocation17_spill]] %s1362_s6 }
   0x7   :  { %1375 = sst [smem:[#allocation18_spill]] %s1363_s7 }
   0x8   :  { %16 = sst [smem:[#allocation2]] %s1356_s0 }
   0x9   :  { %17 = vsyncpa [#allocation4], 0 }
   0xa   :  { %19 = vsyncpa [#allocation4 + $0x1], 0 }
   0xb   :  { %20 = vsyncpa [#allocation6], 0 }
   0xc   :  { %22 = vsyncpa [#allocation6 + $0x1], 0  ;;  %s1137_s15 = smov 0   ;;  %s1139_s16 = smov 0  }
   0xd   :  { %s1141_s17 = smov 0   ;;  %s1143_s18 = smov 0  }
   0xe LB: > { %1376 = sst [smem:[#allocation10_spill]] %s1073_s17  ;;  %s1158_s0 = sadd.s32 4294967295, %s1077_s18   ;;  %s1077_s18 = sphi %s1143_s18, %s1393_s18   ;;  %s1073_s17 = sphi %s1141_s17, %s1390_s17   ;;  %s1069_s16 = sphi %s1139_s16, %s1392_s16   ;;  %s1065_s15 = sphi %s1137_s15, %s1391_s15  }
   0xf   : > { %s1367_s19 = sadd.s32 4294967294, %s1077_s18   ;;  %s1162_s20 = sadd.s32 1, %s1077_s18  }
  0x10   : > { %s218_s21 = sadd.s32 1, %s1073_s17  ;;  %s215_s22 = ssub.s32 %s1077_s18, %s1162_s20 }
  0x11   : > { %p228_p0 = scmp.ne.s32.totalorder %s1073_s17, %s1069_s16  ;;  %p216_p1 = scmp.eq.s32.totalorder %s215_s22, 0 }
  0x12   : > { %p229_p2 = scmp.eq.s32.totalorder %s1158_s0, 1  ;;  %p234_p3 = scmp.ne.s32.totalorder %s1069_s16, %s1065_s15 }
  0x13   : > { %p235_p4 = scmp.eq.s32.totalorder %s1367_s19, 1  ;;  %p860_p7 = scmp.ge.s32.totalorder %s1077_s18, 1 }
  0x14   : > { %s1175_s23 = scalar_select %p216_p1, %s1073_s17, %s218_s21  }
  0x15   : > { %p1177_p5 = por %p229_p2, %p228_p0  ;;  %p1181_p6 = por %p235_p4, %p234_p3 }
  0x16   : > { %1377 = sst [smem:[#allocation11_spill]] %s1175_s23  ;;  %p344_p8 = scmp.lt.s32.totalorder %s1077_s18, 3 }
  0x18   : > { %p345_p9 = pnand %p860_p7, %p344_p8 }
  0x19   : > { %p402_p10 = scmp.lt.s32.totalorder (!%p345_p9), %s1158_s0, 1  ;;  %s1380_s1 = sld [smem:[#allocation12_spill]] (!%p345_p9) }
  0x1a   : > { %348 = sbr.rel (%p345_p9) target bundleno = 837 (0x345), region = 52  ;;  %s1381_s3 = sld [smem:[#allocation14_spill]] (!%p345_p9) }
  0x1b   : > { %s1382_s2 = sld [smem:[#allocation13_spill]] (!%p345_p9)  ;;  %s385_s11 = sand.u32 (!%p345_p9), 1, %s1069_s16  }
  0x1c   : > { %s1383_s4 = sld [smem:[#allocation15_spill]] (!%p345_p9)  ;;  %s861_s12 = sshll.u32 (!%p345_p9), %s385_s11, 4 }
  0x1d   : > { %s1384_s5 = sld [smem:[#allocation16_spill]] (!%p345_p9)  ;;  %s1269_s14 = sshll.u32 (!%p345_p9), %s1158_s0, 4 }
  0x1e   : > { %s1385_s6 = sld [smem:[#allocation17_spill]] (!%p345_p9)  ;;  %s387_s28 = scalar_lea.vmem (!%p345_p9), [#allocation3], %s861_s12 }
  0x1f   : > { %s403_s26 = scalar_select %p402_p10, %s1158_s0, 1  ;;  %v437_v17 = vlaneseq  ;;  %vm440_vm0 = vcmask 64512   ;;  %vm472_vm2 = vcmask 261120   ;;  %vm496_vm3 = vcmask 57344  }
  0x20   : > { %s1386_s7 = sld [smem:[#allocation18_spill]]  ;;  %s975_s21 = scalar_lea.hbm %s1364_s8, 32 }
  0x21   : > { %s885_s27 = sshll.u32 %s403_s26, 4  ;;  %v438_v21 = vand.u32 127, %v437_v17  ;;  %v619_v56 = vshrl.u32 %v437_v17, 7  ;;  %s676_s26 = scalar_lea.hbm %s1364_s8, %s1269_s14 }
  0x22   : > { %s406_s30 = scalar_lea.vmem %s1380_s1, %s885_s27  ;;  %s416_s13 = scalar_lea.vmem %s1381_s3, %s885_s27  ;;  %v435_v9 = vld [vmem:[%s1383_s4] sm:$0xff] }
  0x23   : > { %v1192_v0 = vld [vmem:[%s406_s30] sm:$0xff]  ;;  %v1194_v1 = vld [vmem:[%s406_s30 + $0x8] sm:$0xff]  ;;  %s411_s22 = scalar_lea.vmem %s1382_s2, %s885_s27  ;;  %458 = vmatpush.msra.mxu0 %v435_v9  ;;  %v471_v10 = vld [vmem:[%s1384_s5 + $0x18] sm:$0xff]  ;;  %s463_s30 = sld [smem:[#allocation2]]  ;;  %941 = vset.pattern.permute.xlu1 %v619_v56 }
  0x24   : > { %v419_v2 = vadd.f32 %v1194_v1, %v1192_v0  ;;  %v1204_v3 = vld [vmem:[%s416_s13] sm:$0xff]  ;;  %v1206_v4 = vld [vmem:[%s416_s13 + $0x8] sm:$0xff]  ;;  %v524_v11 = vld [vmem:[%s1385_s6 + $0x18] sm:$0xff]  ;;  %488 = vmatpush.msra.mxu1 %v471_v10  ;;  %940 = vset.pattern.permute.xlu0 %v619_v56  ;;  %s1264_s13 = scalar_lea.vmem [#allocation7], %s861_s12  ;;  %s678_s27 = sshll.u32 %s387_s28, 4  ;;  %s679_s27 = int_to_ptr.vmem [resolvable:$true] %s678_s27 }
  0x25   : > { %v430_v5 = vadd.f32 %v1206_v4, %v1204_v3  ;;  %v1210_v6 = vld [vmem:[%s411_s22] sm:$0xff]  ;;  %v1212_v7 = vld [vmem:[%s411_s22 + $0x8] sm:$0xff]  ;;  %537 = vmatpush.msra.mxu2 %v524_v11  ;;  %v470_v13 = vld [vmem:[%s1384_s5 + $0x10] sm:$0xff]  ;;  %942 = vset.pattern.permute.xlu2 %v619_v56  ;;  %s1275_s29 = sshll.u32 %s676_s26, 4  ;;  %s691_s1 = scalar_lea.hbm %s1365_s9, %s1269_s14  ;;  %s681_s29 = int_to_ptr.hbm [resolvable:$true] %s1275_s29 }
  0x26   : > { %420 = vadd.xlane.f32.xlu0 %v419_v2  ;;  %v424_v8 = vadd.f32 %v1212_v7, %v1210_v6  ;;  %v572_v12 = vld [vmem:[%s1386_s7 + $0x18] sm:$0xff]  ;;  %v523_v14 = vld [vmem:[%s1385_s6 + $0x10] sm:$0xff]  ;;  %489 = vmatpush.msra.mxu1 %v470_v13  ;;  %v469_v25 = vld [vmem:[%s1384_s5 + $0x8] sm:$0xff]  ;;  %s706_s26 = scalar_lea.hbm %s1366_s10, %s1269_s14  ;;  %s394_s3 = scalar_lea.vmem [#allocation5], %s861_s12 }
  0x27   : > { %431 = vadd.xlane.f32.xlu1 %v430_v5  ;;  %v571_v15 = vld [vmem:[%s1386_s7 + $0x10] sm:$0xff]  ;;  %585 = vmatpush.msra.mxu3 %v572_v12  ;;  %v522_v26 = vld [vmem:[%s1385_s6 + $0x8] sm:$0xff]  ;;  %v468_v28 = vld [vmem:[%s1384_s5] sm:$0xff]  ;;  %s693_s4 = sshll.u32 %s394_s3, 4  ;;  %s1289_s5 = sshll.u32 %s691_s1, 4  ;;  %s694_s4 = int_to_ptr.vmem [resolvable:$true] %s693_s4  ;;  %s696_s5 = int_to_ptr.hbm [resolvable:$true] %s1289_s5 }
  0x28   : > { %538 = vmatpush.msra.mxu2 %v523_v14  ;;  %v570_v27 = vld [vmem:[%s1386_s7 + $0x8] sm:$0xff]  ;;  %490 = vmatpush.msra.mxu1 %v469_v25  ;;  %v521_v29 = vld [vmem:[%s1385_s6] sm:$0xff]  ;;  %s655_s6 = scalar_lea.sflag [#allocation4], %s385_s11 }
  0x29   : > { %586 = vmatpush.msra.mxu3 %v571_v15  ;;  %v569_v30 = vld [vmem:[%s1386_s7] sm:$0xff]  ;;  %v465_v31 = vstv %s463_s30  ;;  %s969_s7 = sshra.s32 %s681_s29, 4  ;;  %s970_s7 = int_to_ptr.hbm [resolvable:$true] %s969_s7 }
  0x2a   : > { %539 = vmatpush.msra.mxu2 %v522_v26  ;;  %491 = vmatpush.msra.mxu1 %v468_v28  ;;  %s971_s23 = scalar_lea.hbm %s970_s7, 16  ;;  %p976_p0 = scmp.lt.s32.totalorder %s970_s7, %s1364_s8 }
  0x2b   : > { %587 = vmatpush.msra.mxu3 %v570_v27  ;;  %p972_p11 = scmp.ne.s32.totalorder %s970_s7, %s971_s23  ;;  %p977_p1 = scmp.lt.s32.totalorder %s975_s21, %s971_s23 }
  0x2c   : > { %540 = vmatpush.msra.mxu2 %v521_v29 }
  0x2d   : > { %588 = vmatpush.msra.mxu3 %v569_v30  ;;  %p973_p12 = pnand %p972_p11, %p1177_p5  ;;  %p978_p2 = por %p977_p1, %p976_p0 }
  0x2e   : > { %425 = vadd.xlane.f32.xlu0 %v424_v8 }
  0x2f   : > { %p974_p13 = pneg %p973_p12 }
  0x31   : > { %p979_p3 = pnand %p978_p2, %p974_p13 }
  0x99   : > { %v421_v16 = vpop.xlane.xlu0 %420 }
  0x9a   : > { %v432_v19 = vpop.xlane.xlu1 %431 }
  0xa1   : > { %v426_v18 = vpop.xlane.xlu0 %425 }
  0xa2   : > { %v427_v20 = vadd.f32 %v426_v18, %v421_v16 }
  0xa4   : > { %v433_v22 = vadd.f32 %v432_v19, %v427_v20 }
  0xa6   : > { %v434_v23 = vmul.f32 0.00390625, %v433_v22 }
  0xa8   : > { %v439_v24 = vperm.slane %v434_v23, %v438_v21 }
  0xaa   : > { %870 = vmatmul.msk.f32.vlgmr.msra.gmra.mxu0 %vm440_vm0, %v439_v24 }
 0x127   : > { %v460_v32 = vpop.f32.mrf.mxu0 }
 0x128   : > { %vm464_vm1 = vcmp.ge.f32.partialorder %v460_v32, 0.0  ;;  %v466_v33 = vmul.f32 %v465_v31, %v460_v32 }
 0x12a   : > { %v467_v34 = vsel %vm464_vm1, %v460_v32, %v466_v33 }
 0x12b   : > { %871 = vmatmul.msk.f32.vlgmr.msra.gmra.mxu1 %vm472_vm2, %v467_v34  ;;  %872 = vmatmul.msk.f32.vlgmr.msra.gmra.mxu2 %vm472_vm2, %v467_v34 }
 0x12c   : > { %873 = vmatmul.msk.f32.vlgmr.msra.gmra.mxu3 %vm472_vm2, %v467_v34 }
 0x1a8   : > { %v493_v35 = vpop.f32.mrf.mxu1 }
 0x1a9   : > { %v497_v36 = vsel %vm496_vm3, %v493_v35, -inf }
 0x1aa   : > { %498 = vmax.xlane.f32.xlu2 %v497_v36 }
 0x1ae   : > { %v542_v37 = vpop.f32.mrf.mxu2 }
 0x1af   : > { %v590_v38 = vpop.f32.mrf.mxu3  ;;  %v545_v39 = vsel %vm496_vm3, %v542_v37, -inf }
 0x1b0   : > { %546 = vmax.xlane.f32.xlu1 %v545_v39  ;;  %v593_v40 = vsel %vm496_vm3, %v590_v38, -inf }
 0x1b2   : > { %594 = vmax.xlane.f32.xlu2 %v593_v40 }
 0x21d   : > { %v499_v41 = vpop.xlane.xlu2 %498 }
 0x21e   : > { %v500_v42 = vsub.f32 %v493_v35, %v499_v41 }
 0x220   : > { %v501_v43 = vmul.f32 1.442695, %v500_v42 }
 0x222   : > { %943 = vpow2.f32 %v501_v43 }
 0x223   : > { %v547_v44 = vpop.xlane.xlu1 %546 }
 0x224   : > { %v548_v45 = vsub.f32 %v542_v37, %v547_v44 }
 0x225   : > { %v595_v46 = vpop.xlane.xlu2 %594 }
 0x226   : > { %v549_v47 = vmul.f32 1.442695, %v548_v45  ;;  %v596_v48 = vsub.f32 %v590_v38, %v595_v46 }
 0x228   : > { %v944_v49 = vpop.eup %943  ;;  %945 = vpow2.f32 %v549_v47  ;;  %v597_v50 = vmul.f32 1.442695, %v596_v48 }
 0x229   : > { %v503_v51 = vsel %vm496_vm3, %v944_v49, 0.0 }
 0x22a   : > { %947 = vpow2.f32 %v597_v50  ;;  %504 = vadd.xlane.f32.xlu1 %v503_v51 }
 0x22e   : > { %v946_v52 = vpop.eup %945 }
 0x22f   : > { %v551_v53 = vsel %vm496_vm3, %v946_v52, 0.0 }
 0x230   : > { %v948_v54 = vpop.eup %947  ;;  %552 = vadd.xlane.f32.xlu0 %v551_v53 }
 0x231   : > { %v599_v55 = vsel %vm496_vm3, %v948_v54, 0.0 }
 0x232   : > { %600 = vadd.xlane.f32.xlu2 %v599_v55 }
 0x29d   : > { %v505_v57 = vpop.xlane.xlu1 %504 }
 0x29e   : > { %949 = vrcp.f32 %v505_v57  ;;  %v517_v63 = vand.u32 2147483648, %v505_v57  ;;  %v515_v5 = vand.u32 2147483647, %v505_v57  ;;  %vm511_vm5 = vweird.f32 %v505_v57 }
 0x2a0   : > { %v518_v12 = vor.u32 1.1754944e-38, %v517_v63  ;;  %vm516_vm7 = vcmp.eq.f32.partialorder %v515_v5, 8.507059e+37 }
 0x2a3   : > { %v553_v58 = vpop.xlane.xlu0 %552 }
 0x2a4   : > { %v950_v59 = vpop.eup %949  ;;  %951 = vrcp.f32 %v553_v58  ;;  %v565_v16 = vand.u32 2147483648, %v553_v58  ;;  %v563_v18 = vand.u32 2147483647, %v553_v58  ;;  %vm559_vm9 = vweird.f32 %v553_v58 }
 0x2a5   : > { %v507_v60 = vmul.f32 %v950_v59, %v505_v57  ;;  %v601_v61 = vpop.xlane.xlu2 %600  ;;  %vm512_vm4 = vweird.f32 %v950_v59 }
 0x2a6   : > { %953 = vrcp.f32 %v601_v61  ;;  %vm513_vm6 = vmor %vm511_vm5, %vm512_vm4  ;;  %v613_v22 = vand.u32 2147483648, %v601_v61  ;;  %v611_v23 = vand.u32 2147483647, %v601_v61  ;;  %v566_v27 = vor.u32 1.1754944e-38, %v565_v16 }
 0x2a7   : > { %v508_v62 = vsub.f32 1.0, %v507_v60  ;;  %vm607_vm12 = vweird.f32 %v601_v61  ;;  %vm564_vm13 = vcmp.eq.f32.partialorder %v563_v18, 8.507059e+37 }
 0x2a8   : > { %v614_v30 = vor.u32 1.1754944e-38, %v613_v22  ;;  %vm612_vm15 = vcmp.eq.f32.partialorder %v611_v23, 8.507059e+37 }
 0x2a9   : > { %v509_v2 = vmul.f32 %v950_v59, %v508_v62 }
 0x2aa   : > { %v952_v8 = vpop.eup %951 }
 0x2ab   : > { %v555_v9 = vmul.f32 %v952_v8, %v553_v58  ;;  %v510_v10 = vadd.f32 %v950_v59, %v509_v2  ;;  %vm560_vm8 = vweird.f32 %v952_v8 }
 0x2ac   : > { %v954_v11 = vpop.eup %953  ;;  %vm561_vm11 = vmor %vm559_vm9, %vm560_vm8 }
 0x2ad   : > { %v556_v13 = vsub.f32 1.0, %v555_v9  ;;  %v603_v14 = vmul.f32 %v954_v11, %v601_v61  ;;  %v514_v15 = vsel %vm513_vm6, %v950_v59, %v510_v10  ;;  %vm608_vm10 = vweird.f32 %v954_v11 }
 0x2ae   : > { %v519_v17 = vsel %vm516_vm7, %v518_v12, %v514_v15  ;;  %vm609_vm14 = vmor %vm607_vm12, %vm608_vm10 }
 0x2af   : > { %v557_v19 = vmul.f32 %v952_v8, %v556_v13  ;;  %v604_v20 = vsub.f32 1.0, %v603_v14  ;;  %v520_v21 = vmul.f32 %v944_v49, %v519_v17 }
 0x2b1   : > { %v605_v24 = vmul.f32 %v954_v11, %v604_v20  ;;  %v617_v25 = vperm.slane %v520_v21, 0  ;;  %v558_v26 = vadd.f32 %v952_v8, %v557_v19 }
 0x2b3   : > { %622 = vperm.xlu1 %941, %v617_v25   ;;  %v562_v28 = vsel %vm561_vm11, %v952_v8, %v558_v26  ;;  %v606_v29 = vadd.f32 %v954_v11, %v605_v24 }
 0x2b4   : > { %v567_v31 = vsel %vm564_vm13, %v566_v27, %v562_v28 }
 0x2b5   : > { %v568_v32 = vmul.f32 %v946_v52, %v567_v31  ;;  %v610_v33 = vsel %vm609_vm14, %v954_v11, %v606_v29 }
 0x2b6   : > { %v615_v34 = vsel %vm612_vm15, %v614_v30, %v610_v33 }
 0x2b7   : > { %v630_v35 = vperm.slane %v568_v32, 0  ;;  %v616_v36 = vmul.f32 %v948_v54, %v615_v34 }
 0x2b9   : > { %635 = vperm.xlu0 %940, %v630_v35   ;;  %v643_v37 = vperm.slane %v616_v36, 0 }
 0x2bb   : > { %648 = vperm.xlu2 %942, %v643_v37  }
 0x315   : > { %v649_v38 = vpop.permute.xlu2 %648 }
 0x316   : > { %v650_v39 = vmul.f32 %v649_v38, %v1204_v3  ;;  %v651_v40 = vmul.f32 %v649_v38, %v1206_v4 }
 0x318   : > { %652 = vst [vmem:[%s1264_s13] sm:$0xff] %v650_v39 }
 0x319   : > { %653 = vst [vmem:[%s1264_s13 + $0x8] sm:$0xff] %v651_v40 }
 0x325   : > { %v623_v3 = vpop.permute.xlu1 %622 }
 0x326   : > { %v624_v4 = vmul.f32 %v623_v3, %v1192_v0  ;;  %v625_v41 = vmul.f32 %v623_v3, %v1194_v1 }
 0x328   : > { %626 = vst [vmem:[%s387_s28] sm:$0xff] %v624_v4 }
 0x329   : > { %627 = vst [vmem:[%s387_s28 + $0x8] sm:$0xff] %v625_v41 }
 0x32a   : > { %982 = shalt.err (!%p979_p3)
}
 0x32b   : > { %891 = dma.vmem_to_hbm [thread:$0]  (%p1177_p5), %s679_s27, 256, %s681_s29, %s655_s6   ;;  %v636_v0 = vpop.permute.xlu0 %635 }
 0x32c   : > { %s708_s1 = sshll.u32 %s1264_s13, 4  ;;  %s1302_s11 = sshll.u32 %s706_s26, 4  ;;  %v637_v1 = vmul.f32 %v636_v0, %v1210_v6  ;;  %v638_v42 = vmul.f32 %v636_v0, %v1212_v7  ;;  %s1307_s1 = int_to_ptr.vmem [resolvable:$true] %s708_s1  ;;  %s711_s11 = int_to_ptr.hbm [resolvable:$true] %s1302_s11 }
 0x32d   : > { %s1387_s7 = sand.u32 1, %s1158_s0   ;;  %s997_s6 = sshra.s32 %s696_s5, 4  ;;  %s998_s6 = int_to_ptr.hbm [resolvable:$true] %s997_s6 }
 0x32e   : > { %639 = vst [vmem:[%s394_s3] sm:$0xff] %v637_v1  ;;  %s660_s17 = scalar_lea.sflag [#allocation6], %s1387_s7  ;;  %s999_s23 = scalar_lea.hbm %s998_s6, 16 }
 0x32f   : > { %640 = vst [vmem:[%s394_s3 + $0x8] sm:$0xff] %v638_v42  ;;  %p1000_p4 = scmp.ne.s32.totalorder %s998_s6, %s999_s23  ;;  %s1003_s14 = scalar_lea.hbm %s1365_s9, 32 }
 0x330   : > { %p1004_p9 = scmp.lt.s32.totalorder %s998_s6, %s1365_s9  ;;  %p1005_p10 = scmp.lt.s32.totalorder %s1003_s14, %s999_s23 }
 0x331   : > { %p1001_p7 = pnand %p1000_p4, %p1177_p5 }
 0x332   : > { %p1006_p11 = por %p1005_p10, %p1004_p9 }
 0x333   : > { %p1002_p8 = pneg %p1001_p7 }
 0x335   : > { %p1007_p12 = pnand %p1006_p11, %p1002_p8 }
 0x337   : > { %1010 = shalt.err (!%p1007_p12)
}
 0x338   : > { %892 = dma.vmem_to_hbm [thread:$0]  (%p1177_p5), %s694_s4, 256, %s696_s5, %s660_s17  }
 0x339   : > { %s1025_s3 = sshra.s32 %s711_s11, 4  ;;  %s1031_s22 = scalar_lea.hbm %s1366_s10, 32  ;;  %s1026_s3 = int_to_ptr.hbm [resolvable:$true] %s1025_s3 }
 0x33a   : > { %s1027_s0 = scalar_lea.hbm %s1026_s3, 16  ;;  %p1032_p2 = scmp.lt.s32.totalorder %s1026_s3, %s1366_s10 }
 0x33b   : > { %p1028_p13 = scmp.ne.s32.totalorder %s1026_s3, %s1027_s0  ;;  %p1033_p3 = scmp.lt.s32.totalorder %s1031_s22, %s1027_s0 }
 0x33d   : > { %p1029_p0 = pnand %p1028_p13, %p1177_p5  ;;  %p1034_p4 = por %p1033_p3, %p1032_p2 }
 0x33f   : > { %p1030_p1 = pneg %p1029_p0 }
 0x341   : > { %p1035_p7 = pnand %p1034_p4, %p1030_p1 }
 0x343   : > { %1038 = shalt.err (!%p1035_p7)
}
 0x344   : > { %893 = dma.vmem_to_hbm [thread:$0]  (%p1177_p5), %s1307_s1, 256, %s711_s11, %s660_s17  }
 0x345 PF: > { %p907_p8 = scmp.ge.s32.totalorder %s1077_s18, 2  ;;  %s722_s4 = sand.u32 1, %s1065_s15  }
 0x346   : > { %s723_s5 = scalar_lea.sflag [#allocation4], %s722_s4 }
 0x347   : > { %p898_p9 = pnand %p907_p8, %p1181_p6 }
 0x349   : > { %p899_p10 = pneg %p898_p9 }
 0x34b   : > { %1056 = dma.done.wait (%p899_p10), %s723_s5, 256  }
 0x34c   : > { %1058 = vsyncadd (%p899_p10), %s723_s5, 4294967040  ;;  %s1388_s30 = sadd.s32 4294967294, %s1077_s18  }
 0x34d   : > { %s732_s2 = sand.u32 1, %s1388_s30  }
 0x34e   : > { %s733_s24 = scalar_lea.sflag [#allocation6], %s732_s2 }
 0x34f   : > { %1060 = dma.done.wait (%p899_p10), %s733_s24, 512  }
 0x350   : > { %1062 = vsyncadd (%p899_p10), %s733_s24, 4294966784  ;;  %s1389_s1 = sld [smem:[#allocation10_spill]]  ;;  %p25_p5 = scmp.ge.s32.totalorder %s1162_s20, 4  }
 0x351   : > { %s1390_s17 = sld [smem:[#allocation11_spill]]  ;;  %s1391_s15 = smov %s1069_s16 }
 0x352   : > { %s1393_s18 = smov %s1162_s20  ;;  %27 = sbr.rel (!%p25_p5) target bundleno = 14 (0xe), region = 125 }
 0x356   : > { %s1392_s16 = smov %s1389_s1 }
 0x357   :  { %749 = vsyncpa [#allocation4], 1 }
 0x358   :  { %751 = vsyncpa [#allocation4 + $0x1], 1 }
 0x359   :  { %752 = vsyncpa [#allocation6], 1 }
 0x35a   :  { %754 = vsyncpa [#allocation6 + $0x1], 1 }

</bundles_post_ra>
